<compile_context>
chip_gen: v7x
topology: tpu7x:2x2x1
jax: 0.10.0
libtpu: 0.0.40
codegen_flags: <defaults>
</compile_context>

<pallas_src>
import functools

import jax
import jax.numpy as jnp
from jax.experimental import pallas as pl
from jax.experimental.pallas import tpu as pltpu

NEG_SLOPE = 0.2      # torch_geometric GATConv default LeakyReLU slope
MASK_VAL = -1e30     # masked-score value (finite, so all-masked KV tiles stay NaN-free)


# ----------------------------------------------------------------------------- helpers
def _device_kind():
    try:
        return jax.devices()[0].device_kind.lower()
    except Exception:
        return ""


def _select_exp_dtype():
    # bf16 VALU/EUP exist on v6e/v7x; v5e would unpack and gain nothing.
    kind = _device_kind()
    return jnp.bfloat16 if ("v6" in kind or "v7" in kind) else jnp.float32


def _vmem_limit_bytes():
    kind = _device_kind()
    fallback = (64 if "v7" in kind else 128) * 1024 * 1024
    try:
        phys = pltpu.get_tpu_info().vmem_capacity_bytes
    except Exception:
        phys = fallback
    # ~3/4 of physical, capped at 100 MiB (keep double-buffer headroom).
    return int(min(phys * 3 // 4, 100 * 1024 * 1024))


def _pick_tile(n_pad, want):
    # n_pad and want are multiples of 128; largest tile <= want that divides n_pad.
    t = min(want, n_pad)
    while n_pad % t != 0:
        t -= 128
    return t


# ----------------------------------------------------------------------------- pass 1
def _proj_kernel(x_ref, w_ref, asrc_mat_ref, adst_mat_ref, xp_ref, asrc_ref, adst_ref):
    # bf16 operands, f32 accumulation on the MXU; xp stored directly as bf16.
    xp = jnp.dot(x_ref[...], w_ref[...], preferred_element_type=jnp.float32)   # (TN, H*C)
    xp_ref[...] = xp.astype(xp_ref.dtype)
    # All-head attention logits with one small block-diagonal MXU matmul each.
    asrc_ref[...] = jnp.dot(xp, asrc_mat_ref[...], preferred_element_type=jnp.float32)
    adst_ref[...] = jnp.dot(xp, adst_mat_ref[...], preferred_element_type=jnp.float32)


# ----------------------------------------------------------------------------- pass 2
def _attn_kernel(adstT_ref, asrcT_ref, adj_ref, xpa_ref, x_ref, b_ref, o_ref,
                 m_sc, l_sc, acc_sc, *, heads, out_ch, exp_dtype):
    k = pl.program_id(1)
    nk = pl.num_programs(1)

    @pl.when(k == 0)
    def _():
        m_sc[...] = jnp.full_like(m_sc, -jnp.inf)
        l_sc[...] = jnp.zeros_like(l_sc)
        acc_sc[...] = jnp.zeros_like(acc_sc)

    adst = adstT_ref[...]                          # (H, TN)  destination logits, this row tile
    asrc = asrcT_ref[...]                          # (H, TKV) source logits, this KV tile

    # scores for all heads: s[h, i, j] = a_dst[h, i] + a_src[h, j], LeakyReLU, edge mask
    s = adst[:, :, None] + asrc[:, None, :]        # (H, TN, TKV) f32
    s = jnp.where(s > 0, s, NEG_SLOPE * s)
    mask = adj_ref[...] > 0                        # (TN, TKV) int8 -> bool
    s = jnp.where(mask[None, :, :], s, MASK_VAL)

    # Online softmax. MASK_VAL is finite, so an all-masked KV tile gives p=1 garbage
    # that is wiped by alpha=exp(MASK_VAL - finite)=0 once a valid (self-loop) entry
    # shows up in a later tile; every real row has one.
    m_prev = m_sc[...]                                              # (H, TN, 1)
    m_new = jnp.maximum(m_prev, jnp.max(s, axis=-1, keepdims=True))
    alpha = jnp.exp(m_prev - m_new)                                 # (H, TN, 1) f32
    # bf16 exp/numerator on v6e/v7x (halves VALU/EUP pushes on the dominant passes).
    p = jnp.exp((s - m_new).astype(exp_dtype)).astype(jnp.bfloat16)  # (H, TN, TKV)
    m_sc[...] = m_new

    xpa = xpa_ref[...]                             # (TKV, H*(C+1)) bf16, last col per head = 1
    cw = out_ch + 1
    acc_prev = acc_sc[...]                         # (H, TN, C)
    l_prev = l_sc[...]                             # (H, TN, 1)
    for h in range(heads):                         # small static loop, per-head MXU matmul
        out_h = jnp.dot(p[h], xpa[:, h * cw:(h + 1) * cw],
                        preferred_element_type=jnp.float32)         # (TN, C+1)
        # last column is sum_j p[h,i,j] -> softmax denominator folded into the MXU
        acc_sc[h] = alpha[h] * acc_prev[h] + out_h[:, :out_ch]
        l_sc[h] = alpha[h] * l_prev[h] + out_h[:, out_ch:]

    @pl.when(k == nk - 1)
    def _():
        inv = pl.reciprocal(l_sc[...], approx=True)                 # (H, TN, 1) on the EUP
        parts = [acc_sc[h] * inv[h] for h in range(heads)]          # deferred normalization
        dense = jnp.concatenate(parts, axis=-1)                     # (TN, H*C)
        dense = jnp.maximum(dense + b_ref[...], 0.0)                # bias + act='relu'
        # fused cat([x, dense], 1): single slab store per row tile
        o_ref[...] = jnp.concatenate(
            [x_ref[...].astype(jnp.float32), dense], axis=-1).astype(o_ref.dtype)


# ----------------------------------------------------------------------------- wrapper
def dense_graph_block(x, adj, w, att_src, att_dst, bias, *, heads, out_ch,
                      row_tile=None, kv_tile=512):
    """DenseGraphBlock forward: (cat([x, GATConv(x)+ReLU], 1), edge_index-as-adj)."""
    n, f_in = x.shape
    hc = heads * out_ch
    assert adj.shape == (n, n) and w.shape == (f_in, hc)

    kind = _device_kind()
    if row_tile is None:
        row_tile = 256 if "v6" in kind else 128      # 128 on v5e (MXU) / v7x (64 MiB VMEM)
    exp_dtype = _select_exp_dtype()

    # GATConv add_self_loops=True: ensure the self-loop invariant so every destination
    # row's softmax max is a valid finite logit.
    diag = jnp.arange(n)
    adj_sl = adj.at[diag, diag].set(jnp.int8(1))

    # Pad N to a multiple of 128 (never fall back to a single giant tile).
    n_pad = ((n + 127) // 128) * 128
    if n_pad != n:
        x_p = jnp.zeros((n_pad, f_in), x.dtype).at[:n].set(x)
        adj_p = jnp.zeros((n_pad, n_pad), jnp.int8).at[:n, :n].set(adj_sl)
    else:
        x_p, adj_p = x, adj_sl

    tn = _pick_tile(n_pad, row_tile)
    tkv = _pick_tile(n_pad, kv_tile)

    vmem = _vmem_limit_bytes()
    cp1 = pltpu.CompilerParams(dimension_semantics=("parallel",), vmem_limit_bytes=vmem)
    cp2 = pltpu.CompilerParams(dimension_semantics=("parallel", "arbitrary"),
                               vmem_limit_bytes=vmem)

    # Block-diagonal attention matrices (H*C, H): column h holds att[h] in rows h*C:(h+1)*C.
    rows = jnp.arange(hc)
    cols = jnp.repeat(jnp.arange(heads), out_ch)
    asrc_mat = jnp.zeros((hc, heads), jnp.float32).at[rows, cols].set(att_src.reshape(-1))
    adst_mat = jnp.zeros((hc, heads), jnp.float32).at[rows, cols].set(att_dst.reshape(-1))

    # ---- pass 1: projection + per-head logits (O(N), cheap; single step for small N)
    tn1 = n_pad if n_pad <= 2048 else _pick_tile(n_pad, 512)
    xp16, a_s, a_d = pl.pallas_call(
        _proj_kernel,
        out_shape=(jax.ShapeDtypeStruct((n_pad, hc), jnp.bfloat16),
                   jax.ShapeDtypeStruct((n_pad, heads), jnp.float32),
                   jax.ShapeDtypeStruct((n_pad, heads), jnp.float32)),
        grid=(n_pad // tn1,),
        in_specs=[
            pl.BlockSpec((tn1, f_in), lambda i: (i, 0)),
            pl.BlockSpec((f_in, hc), lambda i: (0, 0)),
            pl.BlockSpec((hc, heads), lambda i: (0, 0)),
            pl.BlockSpec((hc, heads), lambda i: (0, 0)),
        ],
        out_specs=(
            pl.BlockSpec((tn1, hc), lambda i: (i, 0)),
            pl.BlockSpec((tn1, heads), lambda i: (i, 0)),
            pl.BlockSpec((tn1, heads), lambda i: (i, 0)),
        ),
        compiler_params=cp1,
    )(x_p.astype(jnp.bfloat16), w.astype(jnp.bfloat16), asrc_mat, adst_mat)

    # Layout plumbing between the two calls (cheap O(N*H*C) XLA ops):
    # head-major logits, and per-head ones-augmented bf16 features so the softmax
    # denominator falls out of the per-head matmul's last output column.
    adstT = a_d.T                                                    # (H, N_pad)
    asrcT = a_s.T                                                    # (H, N_pad)
    cw = out_ch + 1
    xp_aug = jnp.concatenate(
        [xp16.reshape(n_pad, heads, out_ch),
         jnp.ones((n_pad, heads, 1), jnp.bfloat16)], axis=-1).reshape(n_pad, heads * cw)

    # ---- pass 2: flash-style attention + aggregation over (row tile, KV tile) grid
    kernel = functools.partial(_attn_kernel, heads=heads, out_ch=out_ch, exp_dtype=exp_dtype)
    out = pl.pallas_call(
        kernel,
        out_shape=jax.ShapeDtypeStruct((n_pad, f_in + hc), jnp.float32),
        grid=(n_pad // tn, n_pad // tkv),
        in_specs=[
            pl.BlockSpec((heads, tn), lambda i, k: (0, i)),     # a_dst logits, row tile
            pl.BlockSpec((heads, tkv), lambda i, k: (0, k)),    # a_src logits, KV tile
            pl.BlockSpec((tn, tkv), lambda i, k: (i, k)),       # int8 adjacency, streamed
            pl.BlockSpec((tkv, heads * cw), lambda i, k: (k, 0)),  # bf16 ones-augmented feats
            pl.BlockSpec((tn, f_in), lambda i, k: (i, 0)),      # x pass-through for the concat
            pl.BlockSpec((1, hc), lambda i, k: (0, 0)),         # bias
        ],
        out_specs=pl.BlockSpec((tn, f_in + hc), lambda i, k: (i, 0)),
        scratch_shapes=[
            pltpu.VMEM((heads, tn, 1), jnp.float32),            # running max m
            pltpu.VMEM((heads, tn, 1), jnp.float32),            # running denom l
            pltpu.VMEM((heads, tn, out_ch), jnp.float32),       # running numerator acc
        ],
        compiler_params=cp2,
    )(adstT, asrcT, adj_p, xp_aug, x_p, bias)

    return out[:n], adj     # edge_index (dense adj) passed through unchanged


# ----------------------------------------------------------------------------- reference
def dense_graph_block_ref(x, adj, w, att_src, att_dst, bias, heads, out_ch,
                          exp_dtype=jnp.float32):
    """Pure-JAX reference of the same dense GAT formulation (mirrors kernel numerics)."""
    n = x.shape[0]
    diag = jnp.arange(n)
    adj = adj.at[diag, diag].set(jnp.int8(1))
    xp = jnp.dot(x.astype(jnp.bfloat16), w.astype(jnp.bfloat16),
                 preferred_element_type=jnp.float32)                      # (N, H*C)
    xp16 = xp.astype(jnp.bfloat16)
    xph = xp.reshape(n, heads, out_ch)
    a_s = jnp.einsum("nhc,hc->nh", xph, att_src)
    a_d = jnp.einsum("nhc,hc->nh", xph, att_dst)
    s = a_d.T[:, :, None] + a_s.T[:, None, :]                             # (H, N, N)
    s = jnp.where(s > 0, s, NEG_SLOPE * s)
    s = jnp.where(adj[None] > 0, s, MASK_VAL)
    m = jnp.max(s, axis=-1, keepdims=True)
    p16 = jnp.exp((s - m).astype(exp_dtype)).astype(jnp.bfloat16)
    denom = jnp.sum(p16.astype(jnp.float32), axis=-1, keepdims=True)
    agg = jnp.einsum("hij,hjc->hic", p16,
                     xp16.reshape(n, heads, out_ch).transpose(1, 0, 2),
                     preferred_element_type=jnp.float32) / denom          # (H, N, C)
    dense = agg.transpose(1, 0, 2).reshape(n, heads * out_ch) + bias
    dense = jnp.maximum(dense, 0.0)
    return jnp.concatenate([x, dense], axis=1), adj


if __name__ == "__main__":
    # Small synthetic graph: N nodes, F_in features, C channels/head, H heads, E edges.
    # N=256 exercises a multi-step row grid on chips where row_tile=128.
    N, F_IN, C, H, E = 256, 16, 4, 8, 2048

    key = jax.random.PRNGKey(0)
    kx, ke1, ke2, kw, ks, kd, kb = jax.random.split(key, 7)

    x = jax.random.normal(kx, (N, F_IN), jnp.float32)
    src = jax.random.randint(ke1, (E,), 0, N)
    dst = jax.random.randint(ke2, (E,), 0, N)
    # edge_index -> dense int8 adjacency mask (dst row, src col); self-loops handled in wrapper.
    adj = jnp.zeros((N, N), jnp.int8).at[dst, src].set(1)

    # Parameter shapes from tg.nn.GATConv(F_IN, C, heads=H, bias=True).
    w = jax.random.normal(kw, (F_IN, H * C), jnp.float32) * 0.1
    att_src = jax.random.normal(ks, (H, C), jnp.float32) * 0.1
    att_dst = jax.random.normal(kd, (H, C), jnp.float32) * 0.1
    bias = jax.random.normal(kb, (1, H * C), jnp.float32) * 0.1

    feats, _ = dense_graph_block(x, adj, w, att_src, att_dst, bias, heads=H, out_ch=C)
    feats = jax.block_until_ready(feats)

    ref, _ = dense_graph_block_ref(x, adj, w, att_src, att_dst, bias, H, C,
                                   exp_dtype=_select_exp_dtype())
    assert feats.shape == (N, F_IN + H * C)
    assert jnp.allclose(feats, ref, atol=1e-2, rtol=1e-2), "mismatch vs pure-JAX reference"
    print("KERNEL_OK")
</pallas_src>

<mosaic_0001>
module attributes {stable_mosaic.version = 11 : i64} {
  func.func @_proj_kernel(%arg0: i32, %arg1: memref<256x16xbf16, #tpu.memory_space<vmem>>, %arg2: memref<16x32xbf16, #tpu.memory_space<vmem>>, %arg3: memref<32x8xf32, #tpu.memory_space<vmem>>, %arg4: memref<32x8xf32, #tpu.memory_space<vmem>>, %arg5: memref<256x32xbf16, #tpu.memory_space<vmem>>, %arg6: memref<256x8xf32, #tpu.memory_space<vmem>>, %arg7: memref<256x8xf32, #tpu.memory_space<vmem>>) attributes {dimension_semantics = [#tpu.dimension_semantics<parallel>], iteration_bounds = array<i64: 1>, scalar_prefetch = 0 : i64, scratch_operands = 0 : i64, tpu.core_type = #tpu.core_type<tc>, window_params = [{transform_indices = @transform_0, window_bounds = array<i64: 256, 16>}, {pipeline_mode = #tpu.pipeline_mode<synchronous>, transform_indices = @transform_1, window_bounds = array<i64: 16, 32>}, {pipeline_mode = #tpu.pipeline_mode<synchronous>, transform_indices = @transform_2, window_bounds = array<i64: 32, 8>}, {pipeline_mode = #tpu.pipeline_mode<synchronous>, transform_indices = @transform_3, window_bounds = array<i64: 32, 8>}, {transform_indices = @transform_4, window_bounds = array<i64: 256, 32>}, {transform_indices = @transform_5, window_bounds = array<i64: 256, 8>}, {transform_indices = @transform_6, window_bounds = array<i64: 256, 8>}]} {
    %c0 = arith.constant 0 : index
    %c0_0 = arith.constant 0 : index
    %0 = vector.load %arg1[%c0, %c0_0] : memref<256x16xbf16, #tpu.memory_space<vmem>>, vector<256x16xbf16>
    %c0_1 = arith.constant 0 : index
    %c0_2 = arith.constant 0 : index
    %1 = vector.load %arg2[%c0_1, %c0_2] : memref<16x32xbf16, #tpu.memory_space<vmem>>, vector<16x32xbf16>
    %cst = arith.constant dense<0.000000e+00> : vector<256x32xf32>
    %2 = tpu.matmul %0, %1, %cst {dimension_numbers = #tpu.dot_dimension_numbers<[1], [0], [0], [1], [0, 0, 1, 1], [], []>} : vector<256x16xbf16>, vector<16x32xbf16>, vector<256x32xf32> -> vector<256x32xf32>
    %3 = arith.truncf %2 : vector<256x32xf32> to vector<256x32xbf16>
    %c0_3 = arith.constant 0 : index
    %c0_4 = arith.constant 0 : index
    %4 = vector.load %arg5[%c0_3, %c0_4] : memref<256x32xbf16, #tpu.memory_space<vmem>>, vector<256x32xbf16>
    tpu.vector_store %arg5[%c0_3, %c0_4], %3 {strides = array<i32>} : memref<256x32xbf16, #tpu.memory_space<vmem>>, vector<256x32xbf16>,
    %c0_5 = arith.constant 0 : index
    %c0_6 = arith.constant 0 : index
    %5 = vector.load %arg3[%c0_5, %c0_6] : memref<32x8xf32, #tpu.memory_space<vmem>>, vector<32x8xf32>
    %cst_7 = arith.constant dense<0.000000e+00> : vector<256x8xf32>
    %6 = tpu.matmul %2, %5, %cst_7 {dimension_numbers = #tpu.dot_dimension_numbers<[1], [0], [0], [1], [0, 0, 1, 1], [], []>} : vector<256x32xf32>, vector<32x8xf32>, vector<256x8xf32> -> vector<256x8xf32>
    %c0_8 = arith.constant 0 : index
    %c0_9 = arith.constant 0 : index
    %7 = vector.load %arg6[%c0_8, %c0_9] : memref<256x8xf32, #tpu.memory_space<vmem>>, vector<256x8xf32>
    tpu.vector_store %arg6[%c0_8, %c0_9], %6 {strides = array<i32>} : memref<256x8xf32, #tpu.memory_space<vmem>>, vector<256x8xf32>,
    %c0_10 = arith.constant 0 : index
    %c0_11 = arith.constant 0 : index
    %8 = vector.load %arg4[%c0_10, %c0_11] : memref<32x8xf32, #tpu.memory_space<vmem>>, vector<32x8xf32>
    %cst_12 = arith.constant dense<0.000000e+00> : vector<256x8xf32>
    %9 = tpu.matmul %2, %8, %cst_12 {dimension_numbers = #tpu.dot_dimension_numbers<[1], [0], [0], [1], [0, 0, 1, 1], [], []>} : vector<256x32xf32>, vector<32x8xf32>, vector<256x8xf32> -> vector<256x8xf32>
    %c0_13 = arith.constant 0 : index
    %c0_14 = arith.constant 0 : index
    %10 = vector.load %arg7[%c0_13, %c0_14] : memref<256x8xf32, #tpu.memory_space<vmem>>, vector<256x8xf32>
    tpu.vector_store %arg7[%c0_13, %c0_14], %9 {strides = array<i32>} : memref<256x8xf32, #tpu.memory_space<vmem>>, vector<256x8xf32>,
    return
  }
  func.func @transform_0(%arg0: i32) -> (i32, i32) {
    %c0_i32 = arith.constant 0 : i32
    %c0_i32_0 = arith.constant 0 : i32
    return %arg0, %c0_i32 : i32, i32
  }
  func.func @transform_1(%arg0: i32) -> (i32, i32) {
    %c0_i32 = arith.constant 0 : i32
    %c0_i32_0 = arith.constant 0 : i32
    %c0_i32_1 = arith.constant 0 : i32
    return %c0_i32, %c0_i32_0 : i32, i32
  }
  func.func @transform_2(%arg0: i32) -> (i32, i32) {
    %c0_i32 = arith.constant 0 : i32
    %c0_i32_0 = arith.constant 0 : i32
    %c0_i32_1 = arith.constant 0 : i32
    return %c0_i32, %c0_i32_0 : i32, i32
  }
  func.func @transform_3(%arg0: i32) -> (i32, i32) {
    %c0_i32 = arith.constant 0 : i32
    %c0_i32_0 = arith.constant 0 : i32
    %c0_i32_1 = arith.constant 0 : i32
    return %c0_i32, %c0_i32_0 : i32, i32
  }
  func.func @transform_4(%arg0: i32) -> (i32, i32) {
    %c0_i32 = arith.constant 0 : i32
    %c0_i32_0 = arith.constant 0 : i32
    return %arg0, %c0_i32 : i32, i32
  }
  func.func @transform_5(%arg0: i32) -> (i32, i32) {
    %c0_i32 = arith.constant 0 : i32
    %c0_i32_0 = arith.constant 0 : i32
    return %arg0, %c0_i32 : i32, i32
  }
  func.func @transform_6(%arg0: i32) -> (i32, i32) {
    %c0_i32 = arith.constant 0 : i32
    %c0_i32_0 = arith.constant 0 : i32
    return %arg0, %c0_i32 : i32, i32
  }
}

</mosaic_0001>

<bundles_post_ra>
// kernel: tpu_custom_call.1
= control target key start
LH: loop header
LB: loop body
LE: loop exit
PB: predicated region body
PF: predicated region fallthrough
CT: control target
= control target key end

     0   :  { %12 = vsyncpa [#allocation3], 0  ;;  %s2240_s0 = inlined_call_operand.hbm [shape: bf16[256,16], index: 0, kind: input, shape index: {}]   ;;  %s2241_s1 = inlined_call_operand.hbm [shape: bf16[16,32], index: 1, kind: input, shape index: {}]   ;;  %s2242_s2 = inlined_call_operand.hbm [shape: f32[32,8], index: 2, kind: input, shape index: {}]   ;;  %s2243_s3 = inlined_call_operand.hbm [shape: f32[32,8], index: 3, kind: input, shape index: {}]   ;;  %s2244_s4 = inlined_call_operand.hbm [shape: bf16[256,32], index: 4, kind: output, shape index: {0}]   ;;  %s2245_s5 = inlined_call_operand.hbm [shape: f32[256,8], index: 5, kind: output, shape index: {1}]   ;;  %s2246_s6 = inlined_call_operand.hbm [shape: f32[256,8], index: 6, kind: output, shape index: {2}]  }
   0x1   :  { %13 = vsyncpa [#allocation6], 0 }
   0x2   :  { %14 = vsyncpa [#allocation9], 0 }
   0x3   :  { %15 = vsyncpa [#allocation4], 0 }
   0x4   :  { %16 = vsyncpa [#allocation12], 0  ;;  %s1845_s21 = smov [#allocation5]   ;;  %s1846_s23 = smov [#allocation2]  }
   0x5   :  { %s34_s22 = sshll.u32 %s1845_s21, 4  ;;  %s22_s24 = sshll.u32 %s1846_s23, 4  ;;  %s35_s22 = int_to_ptr.vmem [resolvable:$true] %s34_s22  ;;  %s1891_s24 = int_to_ptr.vmem [resolvable:$true] %s22_s24 }
   0x6   :  { %s1681_s27 = scalar_lea.hbm %s2241_s1, 128 }
   0x7   :  { %p1682_p0 = scmp.ne.s32.totalorder %s2241_s1, %s1681_s27  ;;  %p1685_p1 = scmp.lt.u32.totalorder %s1681_s27, %s2241_s1 }
   0x9   :  { %p1687_p2 = pnand %p1685_p1, %p1682_p0 }
   0xb   :  { %1690 = shalt.err (!%p1687_p2)
}
   0xc   :  { %s1691_s8 = scalar_lea.vmem %s35_s22, 128  ;;  %p1696_p4 = scmp.lt.s32.totalorder %s35_s22, %s35_s22 }
   0xd   :  { %p1692_p3 = scmp.ne.s32.totalorder %s35_s22, %s1691_s8  ;;  %p1697_p5 = scmp.lt.s32.totalorder %s1691_s8, %s1691_s8 }
   0xf   :  { %p1698_p6 = por %p1697_p5, %p1696_p4 }
  0x11   :  { %p1699_p7 = pnand %p1698_p6, %p1692_p3 }
  0x13   :  { %1702 = shalt.err (!%p1699_p7)
}
  0x14   :  { %s1847_s9 = smov 64   ;;  %s1848_s10 = smov 4  }
  0x15   :  { %40 = dma.hbm_to_vmem [thread:$0]  %s2241_s1, 128, %s35_s22, [#allocation6], %s1847_s9, %s1847_s9, %s1848_s10  }
  0x16   :  { %s1703_s15 = scalar_lea.hbm %s2240_s0, 2048 }
  0x17   :  { %p1704_p8 = scmp.ne.s32.totalorder %s2240_s0, %s1703_s15  ;;  %p1707_p9 = scmp.lt.u32.totalorder %s1703_s15, %s2240_s0 }
  0x19   :  { %p1709_p10 = pnand %p1707_p9, %p1704_p8 }
  0x1b   :  { %1712 = shalt.err (!%p1709_p10)
}
  0x1c   :  { %s1713_s20 = scalar_lea.vmem %s1891_s24, 2048  ;;  %p1718_p12 = scmp.lt.s32.totalorder %s1891_s24, %s1891_s24 }
  0x1d   :  { %p1714_p11 = scmp.ne.s32.totalorder %s1891_s24, %s1713_s20  ;;  %p1719_p13 = scmp.lt.s32.totalorder %s1713_s20, %s1713_s20 }
  0x1f   :  { %p1720_p0 = por %p1719_p13, %p1718_p12 }
  0x21   :  { %p1721_p1 = pnand %p1720_p0, %p1714_p11 }
  0x23   :  { %1724 = shalt.err (!%p1721_p1)
}
  0x24   :  { %28 = dma.hbm_to_vmem [thread:$0]  %s2240_s0, 2048, %s1891_s24, [#allocation3], %s1847_s9, %s1847_s9, %s1848_s10  }
  0x25   :  { %s1849_s22 = smov [#allocation7]   ;;  %s1725_s27 = scalar_lea.hbm %s2242_s2, 512 }
  0x26   :  { %s46_s23 = sshll.u32 %s1849_s22, 4  ;;  %p1726_p2 = scmp.ne.s32.totalorder %s2242_s2, %s1725_s27  ;;  %s47_s23 = int_to_ptr.vmem [resolvable:$true] %s46_s23 }
  0x27   :  { %p1729_p3 = scmp.lt.u32.totalorder %s1725_s27, %s2242_s2 }
  0x29   :  { %p1731_p4 = pnand %p1729_p3, %p1726_p2 }
  0x2b   :  { %1734 = shalt.err (!%p1731_p4)
}
  0x2c   :  { %s1735_s8 = scalar_lea.vmem %s47_s23, 512  ;;  %p1740_p6 = scmp.lt.s32.totalorder %s47_s23, %s47_s23 }
  0x2d   :  { %p1736_p5 = scmp.ne.s32.totalorder %s47_s23, %s1735_s8  ;;  %p1741_p7 = scmp.lt.s32.totalorder %s1735_s8, %s1735_s8 }
  0x2f   :  { %p1742_p8 = por %p1741_p7, %p1740_p6 }
  0x31   :  { %p1743_p9 = pnand %p1742_p8, %p1736_p5 }
  0x33   :  { %1746 = shalt.err (!%p1743_p9)
}
  0x34   :  { %s1850_s0 = smov 128   ;;  %s1851_s24 = smov 8  }
  0x35   :  { %52 = dma.hbm_to_vmem [thread:$0]  %s2242_s2, 512, %s47_s23, [#allocation6], %s1850_s0, %s1850_s0, %s1851_s24  }
  0x36   :  { %s1852_s13 = smov [#allocation8]   ;;  %s1747_s17 = scalar_lea.hbm %s2243_s3, 512 }
  0x37   :  { %s58_s14 = sshll.u32 %s1852_s13, 4  ;;  %p1748_p10 = scmp.ne.s32.totalorder %s2243_s3, %s1747_s17  ;;  %s59_s14 = int_to_ptr.vmem [resolvable:$true] %s58_s14 }
  0x38   :  { %p1751_p11 = scmp.lt.u32.totalorder %s1747_s17, %s2243_s3 }
  0x3a   :  { %p1753_p12 = pnand %p1751_p11, %p1748_p10 }
  0x3c   :  { %1756 = shalt.err (!%p1753_p12)
}
  0x3d   :  { %s1757_s21 = scalar_lea.vmem %s59_s14, 512  ;;  %p1762_p0 = scmp.lt.s32.totalorder %s59_s14, %s59_s14 }
  0x3e   :  { %p1758_p13 = scmp.ne.s32.totalorder %s59_s14, %s1757_s21  ;;  %p1763_p1 = scmp.lt.s32.totalorder %s1757_s21, %s1757_s21 }
  0x40   :  { %p1764_p2 = por %p1763_p1, %p1762_p0 }
  0x42   :  { %p1765_p3 = pnand %p1764_p2, %p1758_p13 }
  0x44   :  { %1768 = shalt.err (!%p1765_p3)
}
  0x45   :  { %64 = dma.hbm_to_vmem [thread:$0]  %s2243_s3, 512, %s59_s14, [#allocation9], %s1850_s0, %s1850_s0, %s1851_s24  }
  0x46   :  { %1835 = dma.done.wait [#allocation3], 2048  }
  0x47   :  { %1836 = vsyncadd [#allocation3], 4294965248 }
  0x48   :  { %1837 = dma.done.wait [#allocation6], 640  }
  0x49   :  { %1838 = vsyncadd [#allocation6], 4294966656 }
  0x4a   :  { %1839 = dma.done.wait [#allocation9], 512  }
  0x4b   :  { %1840 = vsyncadd [#allocation9], 4294966784  ;;  %v1664_v0 = vld [vmem:[#allocation5] sm:$0xff]   ;;  %vm198_vm0 = vcmask 130048   ;;  %v1666_v2 = vld [vmem:[#allocation2 + $0x8] sm:$0xff]   ;;  %vm573_vm1 = vcmask 261120  }
  0x4c   :  { %v1665_v1 = vld [vmem:[#allocation2] sm:$0xff]   ;;  %1489 = vmatprep.subr.bf16.mxu0 %v1664_v0  ;;  %1651 = vmatprep.subr.bf16.mxu1 %v1664_v0  ;;  %v1667_v3 = vld [vmem:[#allocation2 + $0x10] sm:$0xff]   ;;  %v1668_v4 = vld [vmem:[#allocation2 + $0x18] sm:$0xff]   ;;  %vm536_vm2 = vcmask 257024   ;;  %s1853_s3 = smov [#allocation10]  }
  0x4d   :  { %1490 = vmatpush3.bf16.msra.mxu0 %v1664_v0  ;;  %1491 = vmatprep.mubr.msk.bf16.mxu0 %vm198_vm0, %v1665_v1  ;;  %v1669_v5 = vld [vmem:[#allocation2 + $0x20] sm:$0xff]   ;;  %v1674_v7 = vld [vmem:[#allocation2 + $0x48] sm:$0xff]   ;;  %v1675_v8 = vld [vmem:[#allocation2 + $0x50] sm:$0xff]   ;;  %s1194_s23 = sshll.u32 %s1853_s3, 4  ;;  %s1195_s23 = int_to_ptr.vmem [resolvable:$true] %s1194_s23 }
  0x4e   :  { %1652 = vmatpush3.bf16.msra.mxu1 %v1664_v0  ;;  %v1673_v6 = vld [vmem:[#allocation2 + $0x40] sm:$0xff]   ;;  %v1676_v9 = vld [vmem:[#allocation2 + $0x58] sm:$0xff]   ;;  %v1670_v10 = vld [vmem:[#allocation2 + $0x28] sm:$0xff]   ;;  %s1769_s25 = scalar_lea.vmem %s1195_s23, 2048  ;;  %p1774_p5 = scmp.lt.s32.totalorder %s1195_s23, %s1195_s23 }
  0x4f   :  { %1507 = vmatprep.mubr.msk.bf16.mxu1 %vm198_vm0, %v1673_v6  ;;  %v1677_v11 = vld [vmem:[#allocation2 + $0x60] sm:$0xff]   ;;  %v569_v12 = vld [vmem:[#allocation7] sm:$0xff]  ;;  %v570_v13 = vld [vmem:[#allocation7 + $0x8] sm:$0xff]  ;;  %p1770_p4 = scmp.ne.s32.totalorder %s1195_s23, %s1769_s25  ;;  %p1775_p6 = scmp.lt.s32.totalorder %s1769_s25, %s1769_s25 }
  0x50   :  { %1492 = vmatmul.mubr.msk.bf16.vlgmr.msra.gmra.mrb[0].mxu0 %vm198_vm0, %v1666_v2  ;;  %v928_v14 = vld [vmem:[#allocation8] sm:$0xff]  ;;  %v1635_v15 = vpack.c.bf16 %v570_v13, %v569_v12  ;;  %v929_v16 = vld [vmem:[#allocation8 + $0x8] sm:$0xff]  ;;  %v571_v17 = vld [vmem:[#allocation7 + $0x10] sm:$0xff] }
  0x51   :  { %1495 = vmatprep.mubr.msk.bf16.mxu0 %vm198_vm0, %v1667_v3  ;;  %1508 = vmatmul.mubr.msk.bf16.vlgmr.msra.gmra.mrb[0].mxu1 %vm198_vm0, %v1674_v7  ;;  %v572_v18 = vld [vmem:[#allocation7 + $0x18] sm:$0xff]  ;;  %v1671_v19 = vld [vmem:[#allocation2 + $0x30] sm:$0xff]   ;;  %v1643_v20 = vpack.c.bf16 %v929_v16, %v928_v14  ;;  %v930_v21 = vld [vmem:[#allocation8 + $0x10] sm:$0xff]  ;;  %p1776_p7 = por %p1775_p6, %p1774_p5 }
  0x52   :  { %1511 = vmatprep.mubr.msk.bf16.mxu1 %vm198_vm0, %v1675_v8  ;;  %v931_v22 = vld [vmem:[#allocation8 + $0x18] sm:$0xff]  ;;  %1636 = vmatprep.subr.bf16.mxu1 %v1635_v15  ;;  %v1639_v23 = vpack.c.bf16 %v572_v18, %v571_v17  ;;  %v1678_v25 = vld [vmem:[#allocation2 + $0x68] sm:$0xff]   ;;  %v1679_v26 = vld [vmem:[#allocation2 + $0x70] sm:$0xff]  }
  0x53   :  { %v1647_v24 = vpack.c.bf16 %v931_v22, %v930_v21  ;;  %1638 = vmatpush3.bf16.msra.mxu1 %v1635_v15  ;;  %1644 = vmatprep.subr.bf16.mxu0 %v1643_v20  ;;  %v1672_v27 = vld [vmem:[#allocation2 + $0x38] sm:$0xff]   ;;  %p1777_p8 = pnand %p1776_p7, %p1770_p4 }
  0x54   :  { %1646 = vmatpush3.bf16.msra.mxu0 %v1643_v20  ;;  %1640 = vmatprep.subr.bf16.mxu1 %v1639_v23  ;;  %v1680_v28 = vld [vmem:[#allocation2 + $0x78] sm:$0xff]  }
  0x55   :  { %1648 = vmatprep.subr.bf16.mxu0 %v1647_v24 }
  0x57   :  { %1642 = vmatpush3.bf16.msra.mxu1 %v1639_v23 }
  0x58   :  { %1496 = vmatmul.mubr.msk.bf16.gmra.mrb[4].mxu0 %vm198_vm0, %v1668_v4 }
  0x59   :  { %1499 = vmatprep.mubr.msk.bf16.mxu0 %vm198_vm0, %v1669_v5  ;;  %1512 = vmatmul.mubr.msk.bf16.gmra.mrb[4].mxu1 %vm198_vm0, %v1676_v9 }
  0x5a   :  { %1515 = vmatprep.mubr.msk.bf16.mxu1 %vm198_vm0, %v1677_v11  ;;  %1650 = vmatpush3.bf16.msra.mxu0 %v1647_v24 }
  0x60   :  { %1500 = vmatmul.mubr.msk.bf16.gmra.mrb[8].mxu0 %vm198_vm0, %v1670_v10 }
  0x61   :  { %1503 = vmatprep.mubr.msk.bf16.mxu0 %vm198_vm0, %v1671_v19  ;;  %1516 = vmatmul.mubr.msk.bf16.gmra.mrb[8].mxu1 %vm198_vm0, %v1678_v25 }
  0x62   :  { %1519 = vmatprep.mubr.msk.bf16.mxu1 %vm198_vm0, %v1679_v26 }
  0x68   :  { %1504 = vmatmul.mubr.msk.bf16.gmra.mrb[12].mxu0 %vm198_vm0, %v1672_v27 }
  0x69   :  { %1520 = vmatmul.mubr.msk.bf16.gmra.mrb[12].mxu1 %vm198_vm0, %v1680_v28 }
 0x123   :  { %v1493_v29 = vpop.f32.mrb[0].mxu0 }
 0x124   :  { %v1370_v30 = vpack.c.bf16 %v1493_v29, %v1493_v29  ;;  %v281_v31 = vpop.f32.mrb[1].mxu0  ;;  %v1984_v37 = vpop.f32.mrb[0].mxu1 }
 0x125   :  { %v1368_v32 = vpack.c.bf16 %v281_v31, %v281_v31  ;;  %v1494_v33 = vpop.f32.mrb[2].mxu0  ;;  %1531 = vmatprep.mubr.msk.f32.mxu1 %vm573_vm1, %v281_v31  ;;  %1587 = vmatprep.mubr.msk.f32.mxu0 %vm573_vm1, %v281_v31  ;;  %v1386_v38 = vpack.c.bf16 %v1984_v37, %v1984_v37  ;;  %v1988_v39 = vpop.f32.mrb[1].mxu1 }
 0x126   :  { %539 = vst.msk [vmem:[#allocation10 + $0x8] sm:$0xf] %vm536_vm2, %v1370_v30  ;;  %v1371_v34 = vpack.c.bf16 %v1494_v33, %v1494_v33  ;;  %v284_v35 = vpop.f32.mrb[3].mxu0  ;;  %v1384_v41 = vpack.c.bf16 %v1988_v39, %v1988_v39  ;;  %v1994_v42 = vpop.f32.mrb[2].mxu1 }
 0x127   :  { %537 = vst.msk [vmem:[#allocation10] sm:$0xf] %vm536_vm2, %v1368_v32  ;;  %v1369_v36 = vpack.c.bf16 %v284_v35, %v284_v35  ;;  %1532 = vmatmul.mubr.msk.f32.vlgmr.msra.gmra.mrb[16].mxu1 %vm573_vm1, %v284_v35  ;;  %1588 = vmatmul.mubr.msk.f32.vlgmr.msra.gmra.mrb[16].mxu0 %vm573_vm1, %v284_v35  ;;  %555 = vst.msk [vmem:[#allocation10 + $0x48] sm:$0xf] %vm536_vm2, %v1386_v38  ;;  %v1387_v45 = vpack.c.bf16 %v1994_v42, %v1994_v42  ;;  %v1999_v46 = vpop.f32.mrb[3].mxu1 }
 0x128   :  { %540 = vst.msk [vmem:[#allocation10 + $0xc] sm:$0xf] %vm536_vm2, %v1371_v34  ;;  %1534 = vmatprep.mubr.msk.f32.mxu1 %vm573_vm1, %v1493_v29  ;;  %1590 = vmatprep.mubr.msk.f32.mxu0 %vm573_vm1, %v1493_v29  ;;  %553 = vst.msk [vmem:[#allocation10 + $0x40] sm:$0xf] %vm536_vm2, %v1384_v41  ;;  %v1385_v49 = vpack.c.bf16 %v1999_v46, %v1999_v46 }
 0x129   :  { %538 = vst.msk [vmem:[#allocation10 + $0x4] sm:$0xf] %vm536_vm2, %v1369_v36  ;;  %556 = vst.msk [vmem:[#allocation10 + $0x4c] sm:$0xf] %vm536_vm2, %v1387_v45 }
 0x12a   :  { %554 = vst.msk [vmem:[#allocation10 + $0x44] sm:$0xf] %vm536_vm2, %v1385_v49 }
 0x12b   :  { %v1497_v40 = vpop.f32.mrb[4].mxu0  ;;  %1535 = vmatmul.mubr.msk.f32.gmra.mrb[18].mxu1 %vm573_vm1, %v1494_v33  ;;  %1591 = vmatmul.mubr.msk.f32.gmra.mrb[18].mxu0 %vm573_vm1, %v1494_v33 }
 0x12c   :  { %v1374_v43 = vpack.c.bf16 %v1497_v40, %v1497_v40  ;;  %v297_v44 = vpop.f32.mrb[5].mxu0  ;;  %v2016_v53 = vpop.f32.mrb[4].mxu1 }
 0x12d   :  { %v1372_v47 = vpack.c.bf16 %v297_v44, %v297_v44  ;;  %v1498_v48 = vpop.f32.mrb[6].mxu0  ;;  %1537 = vmatprep.mubr.msk.f32.mxu1 %vm573_vm1, %v297_v44  ;;  %1593 = vmatprep.mubr.msk.f32.mxu0 %vm573_vm1, %v297_v44  ;;  %v1390_v54 = vpack.c.bf16 %v2016_v53, %v2016_v53  ;;  %v2020_v55 = vpop.f32.mrb[5].mxu1 }
 0x12e   :  { %543 = vst.msk [vmem:[#allocation10 + $0x18] sm:$0xf] %vm536_vm2, %v1374_v43  ;;  %v1375_v50 = vpack.c.bf16 %v1498_v48, %v1498_v48  ;;  %v300_v51 = vpop.f32.mrb[7].mxu0  ;;  %v1388_v57 = vpack.c.bf16 %v2020_v55, %v2020_v55  ;;  %v2026_v58 = vpop.f32.mrb[6].mxu1 }
 0x12f   :  { %541 = vst.msk [vmem:[#allocation10 + $0x10] sm:$0xf] %vm536_vm2, %v1372_v47  ;;  %v1373_v52 = vpack.c.bf16 %v300_v51, %v300_v51  ;;  %1538 = vmatmul.mubr.msk.f32.gmra.mrb[20].mxu1 %vm573_vm1, %v300_v51  ;;  %1594 = vmatmul.mubr.msk.f32.gmra.mrb[20].mxu0 %vm573_vm1, %v300_v51  ;;  %559 = vst.msk [vmem:[#allocation10 + $0x58] sm:$0xf] %vm536_vm2, %v1390_v54  ;;  %v1391_v61 = vpack.c.bf16 %v2026_v58, %v2026_v58  ;;  %v2031_v62 = vpop.f32.mrb[7].mxu1 }
 0x130   :  { %544 = vst.msk [vmem:[#allocation10 + $0x1c] sm:$0xf] %vm536_vm2, %v1375_v50  ;;  %1540 = vmatprep.mubr.msk.f32.mxu1 %vm573_vm1, %v1497_v40  ;;  %1596 = vmatprep.mubr.msk.f32.mxu0 %vm573_vm1, %v1497_v40  ;;  %557 = vst.msk [vmem:[#allocation10 + $0x50] sm:$0xf] %vm536_vm2, %v1388_v57  ;;  %v1389_v1 = vpack.c.bf16 %v2031_v62, %v2031_v62 }
 0x131   :  { %542 = vst.msk [vmem:[#allocation10 + $0x14] sm:$0xf] %vm536_vm2, %v1373_v52  ;;  %560 = vst.msk [vmem:[#allocation10 + $0x5c] sm:$0xf] %vm536_vm2, %v1391_v61 }
 0x132   :  { %558 = vst.msk [vmem:[#allocation10 + $0x54] sm:$0xf] %vm536_vm2, %v1389_v1 }
 0x133   :  { %v1501_v56 = vpop.f32.mrb[8].mxu0  ;;  %1541 = vmatmul.mubr.msk.f32.gmra.mrb[22].mxu1 %vm573_vm1, %v1498_v48  ;;  %1597 = vmatmul.mubr.msk.f32.gmra.mrb[22].mxu0 %vm573_vm1, %v1498_v48 }
 0x134   :  { %v1378_v59 = vpack.c.bf16 %v1501_v56, %v1501_v56  ;;  %v313_v60 = vpop.f32.mrb[9].mxu0  ;;  %v2048_v5 = vpop.f32.mrb[8].mxu1 }
 0x135   :  { %v1376_v63 = vpack.c.bf16 %v313_v60, %v313_v60  ;;  %v1502_v0 = vpop.f32.mrb[10].mxu0  ;;  %1543 = vmatprep.mubr.msk.f32.mxu1 %vm573_vm1, %v313_v60  ;;  %1599 = vmatprep.mubr.msk.f32.mxu0 %vm573_vm1, %v313_v60  ;;  %v1394_v6 = vpack.c.bf16 %v2048_v5, %v2048_v5  ;;  %v377_v7 = vpop.f32.mrb[9].mxu1 }
 0x136   :  { %547 = vst.msk [vmem:[#allocation10 + $0x28] sm:$0xf] %vm536_vm2, %v1378_v59  ;;  %v1379_v2 = vpack.c.bf16 %v1502_v0, %v1502_v0  ;;  %v316_v3 = vpop.f32.mrb[11].mxu0  ;;  %v1392_v9 = vpack.c.bf16 %v377_v7, %v377_v7  ;;  %v1518_v10 = vpop.f32.mrb[10].mxu1 }
 0x137   :  { %545 = vst.msk [vmem:[#allocation10 + $0x20] sm:$0xf] %vm536_vm2, %v1376_v63  ;;  %v1377_v4 = vpack.c.bf16 %v316_v3, %v316_v3  ;;  %1544 = vmatmul.mubr.msk.f32.gmra.mrb[24].mxu1 %vm573_vm1, %v316_v3  ;;  %1600 = vmatmul.mubr.msk.f32.gmra.mrb[24].mxu0 %vm573_vm1, %v316_v3  ;;  %563 = vst.msk [vmem:[#allocation10 + $0x68] sm:$0xf] %vm536_vm2, %v1394_v6  ;;  %v1395_v13 = vpack.c.bf16 %v1518_v10, %v1518_v10  ;;  %v380_v14 = vpop.f32.mrb[11].mxu1 }
 0x138   :  { %548 = vst.msk [vmem:[#allocation10 + $0x2c] sm:$0xf] %vm536_vm2, %v1379_v2  ;;  %1546 = vmatprep.mubr.msk.f32.mxu1 %vm573_vm1, %v1501_v56  ;;  %1602 = vmatprep.mubr.msk.f32.mxu0 %vm573_vm1, %v1501_v56  ;;  %561 = vst.msk [vmem:[#allocation10 + $0x60] sm:$0xf] %vm536_vm2, %v1392_v9  ;;  %v1393_v17 = vpack.c.bf16 %v380_v14, %v380_v14 }
 0x139   :  { %546 = vst.msk [vmem:[#allocation10 + $0x24] sm:$0xf] %vm536_vm2, %v1377_v4  ;;  %564 = vst.msk [vmem:[#allocation10 + $0x6c] sm:$0xf] %vm536_vm2, %v1395_v13 }
 0x13a   :  { %562 = vst.msk [vmem:[#allocation10 + $0x64] sm:$0xf] %vm536_vm2, %v1393_v17 }
 0x13b   :  { %v1505_v8 = vpop.f32.mrb[12].mxu0  ;;  %1547 = vmatmul.mubr.msk.f32.gmra.mrb[26].mxu1 %vm573_vm1, %v1502_v0  ;;  %1603 = vmatmul.mubr.msk.f32.gmra.mrb[26].mxu0 %vm573_vm1, %v1502_v0 }
 0x13c   :  { %v1382_v11 = vpack.c.bf16 %v1505_v8, %v1505_v8  ;;  %v329_v12 = vpop.f32.mrb[13].mxu0  ;;  %v1521_v21 = vpop.f32.mrb[12].mxu1 }
 0x13d   :  { %v1380_v15 = vpack.c.bf16 %v329_v12, %v329_v12  ;;  %v1506_v16 = vpop.f32.mrb[14].mxu0  ;;  %1549 = vmatprep.mubr.msk.f32.mxu1 %vm573_vm1, %v329_v12  ;;  %1605 = vmatprep.mubr.msk.f32.mxu0 %vm573_vm1, %v329_v12  ;;  %v1398_v22 = vpack.c.bf16 %v1521_v21, %v1521_v21  ;;  %v393_v23 = vpop.f32.mrb[13].mxu1 }
 0x13e   :  { %551 = vst.msk [vmem:[#allocation10 + $0x38] sm:$0xf] %vm536_vm2, %v1382_v11  ;;  %v1383_v18 = vpack.c.bf16 %v1506_v16, %v1506_v16  ;;  %v332_v19 = vpop.f32.mrb[15].mxu0  ;;  %v1396_v24 = vpack.c.bf16 %v393_v23, %v393_v23  ;;  %v1522_v25 = vpop.f32.mrb[14].mxu1 }
 0x13f   :  { %549 = vst.msk [vmem:[#allocation10 + $0x30] sm:$0xf] %vm536_vm2, %v1380_v15  ;;  %v1381_v20 = vpack.c.bf16 %v332_v19, %v332_v19  ;;  %1550 = vmatmul.mubr.msk.f32.gmra.mrb[28].mxu1 %vm573_vm1, %v332_v19  ;;  %1606 = vmatmul.mubr.msk.f32.gmra.mrb[28].mxu0 %vm573_vm1, %v332_v19  ;;  %567 = vst.msk [vmem:[#allocation10 + $0x78] sm:$0xf] %vm536_vm2, %v1398_v22  ;;  %v1399_v26 = vpack.c.bf16 %v1522_v25, %v1522_v25  ;;  %v396_v27 = vpop.f32.mrb[15].mxu1 }
 0x140   :  { %552 = vst.msk [vmem:[#allocation10 + $0x3c] sm:$0xf] %vm536_vm2, %v1383_v18  ;;  %1552 = vmatprep.mubr.msk.f32.mxu1 %vm573_vm1, %v1505_v8  ;;  %1608 = vmatprep.mubr.msk.f32.mxu0 %vm573_vm1, %v1505_v8  ;;  %565 = vst.msk [vmem:[#allocation10 + $0x70] sm:$0xf] %vm536_vm2, %v1396_v24  ;;  %v1397_v28 = vpack.c.bf16 %v396_v27, %v396_v27 }
 0x141   :  { %550 = vst.msk [vmem:[#allocation10 + $0x34] sm:$0xf] %vm536_vm2, %v1381_v20  ;;  %568 = vst.msk [vmem:[#allocation10 + $0x7c] sm:$0xf] %vm536_vm2, %v1399_v26 }
 0x142   :  { %566 = vst.msk [vmem:[#allocation10 + $0x74] sm:$0xf] %vm536_vm2, %v1397_v28 }
 0x143   :  { %1553 = vmatmul.mubr.msk.f32.gmra.mrb[30].mxu1 %vm573_vm1, %v1506_v16  ;;  %1609 = vmatmul.mubr.msk.f32.gmra.mrb[30].mxu0 %vm573_vm1, %v1506_v16 }
 0x144   :  { %1555 = vmatprep.mubr.msk.f32.mxu1 %vm573_vm1, %v1988_v39  ;;  %1611 = vmatprep.mubr.msk.f32.mxu0 %vm573_vm1, %v1988_v39 }
 0x147   :  { %1556 = vmatmul.mubr.msk.f32.gmra.mrb[32].mxu1 %vm573_vm1, %v1999_v46  ;;  %1612 = vmatmul.mubr.msk.f32.gmra.mrb[32].mxu0 %vm573_vm1, %v1999_v46 }
 0x148   :  { %1558 = vmatprep.mubr.msk.f32.mxu1 %vm573_vm1, %v1984_v37  ;;  %1614 = vmatprep.mubr.msk.f32.mxu0 %vm573_vm1, %v1984_v37 }
 0x14b   :  { %1559 = vmatmul.mubr.msk.f32.gmra.mrb[34].mxu1 %vm573_vm1, %v1994_v42  ;;  %1615 = vmatmul.mubr.msk.f32.gmra.mrb[34].mxu0 %vm573_vm1, %v1994_v42 }
 0x14c   :  { %1561 = vmatprep.mubr.msk.f32.mxu1 %vm573_vm1, %v2020_v55  ;;  %1617 = vmatprep.mubr.msk.f32.mxu0 %vm573_vm1, %v2020_v55 }
 0x14f   :  { %1562 = vmatmul.mubr.msk.f32.gmra.mrb[36].mxu1 %vm573_vm1, %v2031_v62  ;;  %1618 = vmatmul.mubr.msk.f32.gmra.mrb[36].mxu0 %vm573_vm1, %v2031_v62 }
 0x150   :  { %1564 = vmatprep.mubr.msk.f32.mxu1 %vm573_vm1, %v2016_v53  ;;  %1620 = vmatprep.mubr.msk.f32.mxu0 %vm573_vm1, %v2016_v53 }
 0x153   :  { %1565 = vmatmul.mubr.msk.f32.gmra.mrb[38].mxu1 %vm573_vm1, %v2026_v58  ;;  %1621 = vmatmul.mubr.msk.f32.gmra.mrb[38].mxu0 %vm573_vm1, %v2026_v58 }
 0x154   :  { %1567 = vmatprep.mubr.msk.f32.mxu1 %vm573_vm1, %v377_v7  ;;  %1623 = vmatprep.mubr.msk.f32.mxu0 %vm573_vm1, %v377_v7 }
 0x157   :  { %1568 = vmatmul.mubr.msk.f32.gmra.mrb[40].mxu1 %vm573_vm1, %v380_v14  ;;  %1624 = vmatmul.mubr.msk.f32.gmra.mrb[40].mxu0 %vm573_vm1, %v380_v14 }
 0x158   :  { %1570 = vmatprep.mubr.msk.f32.mxu1 %vm573_vm1, %v2048_v5  ;;  %1626 = vmatprep.mubr.msk.f32.mxu0 %vm573_vm1, %v2048_v5 }
 0x15b   :  { %1571 = vmatmul.mubr.msk.f32.gmra.mrb[42].mxu1 %vm573_vm1, %v1518_v10  ;;  %1627 = vmatmul.mubr.msk.f32.gmra.mrb[42].mxu0 %vm573_vm1, %v1518_v10 }
 0x15c   :  { %1573 = vmatprep.mubr.msk.f32.mxu1 %vm573_vm1, %v393_v23  ;;  %1629 = vmatprep.mubr.msk.f32.mxu0 %vm573_vm1, %v393_v23 }
 0x15f   :  { %1574 = vmatmul.mubr.msk.f32.gmra.mrb[44].mxu1 %vm573_vm1, %v396_v27  ;;  %1630 = vmatmul.mubr.msk.f32.gmra.mrb[44].mxu0 %vm573_vm1, %v396_v27 }
 0x160   :  { %1576 = vmatprep.mubr.msk.f32.mxu1 %vm573_vm1, %v1521_v21  ;;  %1632 = vmatprep.mubr.msk.f32.mxu0 %vm573_vm1, %v1521_v21 }
 0x163   :  { %1577 = vmatmul.mubr.msk.f32.gmra.mrb[46].mxu1 %vm573_vm1, %v1522_v25  ;;  %1633 = vmatmul.mubr.msk.f32.gmra.mrb[46].mxu0 %vm573_vm1, %v1522_v25 }
 0x164   :  { %1780 = shalt.err (!%p1777_p8)
}
 0x165   :  { %s1781_s28 = scalar_lea.hbm %s2244_s4, 2048 }
 0x166   :  { %p1782_p9 = scmp.ne.s32.totalorder %s2244_s4, %s1781_s28  ;;  %p1785_p10 = scmp.lt.u32.totalorder %s1781_s28, %s2244_s4 }
 0x168   :  { %p1787_p11 = pnand %p1785_p10, %p1782_p9 }
 0x16a   :  { %1790 = shalt.err (!%p1787_p11)
}
 0x16b   :  { %1200 = dma.vmem_to_hbm [thread:$0]  %s1195_s23, 2048, %s2244_s4, [#allocation4], %s1847_s9, %s1847_s9, %s1848_s10   ;;  %vm895_vm3 = vcmask 64512  }
 0x16c   :  { %s1854_s4 = smov [#allocation11]   ;;  %s1855_s10 = smov [#allocation13]  }
 0x16d   :  { %s1206_s9 = sshll.u32 %s1854_s4, 4  ;;  %s1218_s13 = sshll.u32 %s1855_s10, 4  ;;  %s1207_s9 = int_to_ptr.vmem [resolvable:$true] %s1206_s9  ;;  %s2201_s13 = int_to_ptr.vmem [resolvable:$true] %s1218_s13 }
 0x16e   :  { %s1791_s14 = scalar_lea.vmem %s1207_s9, 4096  ;;  %p1796_p13 = scmp.lt.s32.totalorder %s1207_s9, %s1207_s9 }
 0x16f   :  { %p1792_p12 = scmp.ne.s32.totalorder %s1207_s9, %s1791_s14  ;;  %p1797_p0 = scmp.lt.s32.totalorder %s1791_s14, %s1791_s14 }
 0x171   :  { %p1798_p1 = por %p1797_p0, %p1796_p13 }
 0x173   :  { %p1799_p2 = pnand %p1798_p1, %p1792_p12 }
 0x1fa   :  { %v1533_v29 = vpop.f32.mrb[16].mxu1  ;;  %v1589_v30 = vpop.f32.mrb[16].mxu0 }
 0x1fb   :  { %897 = vst.msk [vmem:[#allocation11 + $0x8] sm:$0xff] %vm895_vm3, %v1533_v29  ;;  %1158 = vst.msk [vmem:[#allocation13 + $0x8] sm:$0xff] %vm895_vm3, %v1589_v30  ;;  %v736_v31 = vpop.f32.mrb[17].mxu1  ;;  %v998_v32 = vpop.f32.mrb[17].mxu0 }
 0x1fc   :  { %896 = vst.msk [vmem:[#allocation11] sm:$0xff] %vm895_vm3, %v736_v31  ;;  %1157 = vst.msk [vmem:[#allocation13] sm:$0xff] %vm895_vm3, %v998_v32 }
 0x1fe   :  { %v1536_v33 = vpop.f32.mrb[18].mxu1  ;;  %v1592_v34 = vpop.f32.mrb[18].mxu0 }
 0x1ff   :  { %899 = vst.msk [vmem:[#allocation11 + $0x18] sm:$0xff] %vm895_vm3, %v1536_v33  ;;  %1160 = vst.msk [vmem:[#allocation13 + $0x18] sm:$0xff] %vm895_vm3, %v1592_v34  ;;  %v746_v35 = vpop.f32.mrb[19].mxu1  ;;  %v1008_v36 = vpop.f32.mrb[19].mxu0 }
 0x200   :  { %898 = vst.msk [vmem:[#allocation11 + $0x10] sm:$0xff] %vm895_vm3, %v746_v35  ;;  %1159 = vst.msk [vmem:[#allocation13 + $0x10] sm:$0xff] %vm895_vm3, %v1008_v36 }
 0x202   :  { %v1539_v37 = vpop.f32.mrb[20].mxu1  ;;  %v1595_v38 = vpop.f32.mrb[20].mxu0 }
 0x203   :  { %901 = vst.msk [vmem:[#allocation11 + $0x28] sm:$0xff] %vm895_vm3, %v1539_v37  ;;  %1162 = vst.msk [vmem:[#allocation13 + $0x28] sm:$0xff] %vm895_vm3, %v1595_v38  ;;  %v756_v39 = vpop.f32.mrb[21].mxu1  ;;  %v1018_v40 = vpop.f32.mrb[21].mxu0 }
 0x204   :  { %900 = vst.msk [vmem:[#allocation11 + $0x20] sm:$0xff] %vm895_vm3, %v756_v39  ;;  %1161 = vst.msk [vmem:[#allocation13 + $0x20] sm:$0xff] %vm895_vm3, %v1018_v40 }
 0x206   :  { %v1542_v41 = vpop.f32.mrb[22].mxu1  ;;  %v1598_v42 = vpop.f32.mrb[22].mxu0 }
 0x207   :  { %903 = vst.msk [vmem:[#allocation11 + $0x38] sm:$0xff] %vm895_vm3, %v1542_v41  ;;  %1164 = vst.msk [vmem:[#allocation13 + $0x38] sm:$0xff] %vm895_vm3, %v1598_v42  ;;  %v766_v43 = vpop.f32.mrb[23].mxu1  ;;  %v1028_v44 = vpop.f32.mrb[23].mxu0 }
 0x208   :  { %902 = vst.msk [vmem:[#allocation11 + $0x30] sm:$0xff] %vm895_vm3, %v766_v43  ;;  %1163 = vst.msk [vmem:[#allocation13 + $0x30] sm:$0xff] %vm895_vm3, %v1028_v44 }
 0x20a   :  { %v1545_v45 = vpop.f32.mrb[24].mxu1  ;;  %v1601_v46 = vpop.f32.mrb[24].mxu0 }
 0x20b   :  { %905 = vst.msk [vmem:[#allocation11 + $0x48] sm:$0xff] %vm895_vm3, %v1545_v45  ;;  %1166 = vst.msk [vmem:[#allocation13 + $0x48] sm:$0xff] %vm895_vm3, %v1601_v46  ;;  %v776_v47 = vpop.f32.mrb[25].mxu1  ;;  %v1038_v48 = vpop.f32.mrb[25].mxu0 }
 0x20c   :  { %904 = vst.msk [vmem:[#allocation11 + $0x40] sm:$0xff] %vm895_vm3, %v776_v47  ;;  %1165 = vst.msk [vmem:[#allocation13 + $0x40] sm:$0xff] %vm895_vm3, %v1038_v48 }
 0x20e   :  { %v1548_v49 = vpop.f32.mrb[26].mxu1  ;;  %v1604_v50 = vpop.f32.mrb[26].mxu0 }
 0x20f   :  { %907 = vst.msk [vmem:[#allocation11 + $0x58] sm:$0xff] %vm895_vm3, %v1548_v49  ;;  %1168 = vst.msk [vmem:[#allocation13 + $0x58] sm:$0xff] %vm895_vm3, %v1604_v50  ;;  %v786_v51 = vpop.f32.mrb[27].mxu1  ;;  %v1048_v52 = vpop.f32.mrb[27].mxu0 }
 0x210   :  { %906 = vst.msk [vmem:[#allocation11 + $0x50] sm:$0xff] %vm895_vm3, %v786_v51  ;;  %1167 = vst.msk [vmem:[#allocation13 + $0x50] sm:$0xff] %vm895_vm3, %v1048_v52 }
 0x212   :  { %v1551_v53 = vpop.f32.mrb[28].mxu1  ;;  %v1607_v54 = vpop.f32.mrb[28].mxu0 }
 0x213   :  { %909 = vst.msk [vmem:[#allocation11 + $0x68] sm:$0xff] %vm895_vm3, %v1551_v53  ;;  %1170 = vst.msk [vmem:[#allocation13 + $0x68] sm:$0xff] %vm895_vm3, %v1607_v54  ;;  %v796_v55 = vpop.f32.mrb[29].mxu1  ;;  %v1058_v56 = vpop.f32.mrb[29].mxu0 }
 0x214   :  { %908 = vst.msk [vmem:[#allocation11 + $0x60] sm:$0xff] %vm895_vm3, %v796_v55  ;;  %1169 = vst.msk [vmem:[#allocation13 + $0x60] sm:$0xff] %vm895_vm3, %v1058_v56 }
 0x216   :  { %v1554_v57 = vpop.f32.mrb[30].mxu1  ;;  %v1610_v58 = vpop.f32.mrb[30].mxu0 }
 0x217   :  { %911 = vst.msk [vmem:[#allocation11 + $0x78] sm:$0xff] %vm895_vm3, %v1554_v57  ;;  %1172 = vst.msk [vmem:[#allocation13 + $0x78] sm:$0xff] %vm895_vm3, %v1610_v58  ;;  %v806_v59 = vpop.f32.mrb[31].mxu1  ;;  %v1068_v60 = vpop.f32.mrb[31].mxu0 }
 0x218   :  { %910 = vst.msk [vmem:[#allocation11 + $0x70] sm:$0xff] %vm895_vm3, %v806_v59  ;;  %1171 = vst.msk [vmem:[#allocation13 + $0x70] sm:$0xff] %vm895_vm3, %v1068_v60 }
 0x21a   :  { %v1557_v61 = vpop.f32.mrb[32].mxu1  ;;  %v1613_v62 = vpop.f32.mrb[32].mxu0 }
 0x21b   :  { %913 = vst.msk [vmem:[#allocation11 + $0x88] sm:$0xff] %vm895_vm3, %v1557_v61  ;;  %1174 = vst.msk [vmem:[#allocation13 + $0x88] sm:$0xff] %vm895_vm3, %v1613_v62  ;;  %v816_v63 = vpop.f32.mrb[33].mxu1  ;;  %v1078_v0 = vpop.f32.mrb[33].mxu0 }
 0x21c   :  { %912 = vst.msk [vmem:[#allocation11 + $0x80] sm:$0xff] %vm895_vm3, %v816_v63  ;;  %1173 = vst.msk [vmem:[#allocation13 + $0x80] sm:$0xff] %vm895_vm3, %v1078_v0 }
 0x21e   :  { %v1560_v1 = vpop.f32.mrb[34].mxu1  ;;  %v1616_v2 = vpop.f32.mrb[34].mxu0 }
 0x21f   :  { %915 = vst.msk [vmem:[#allocation11 + $0x98] sm:$0xff] %vm895_vm3, %v1560_v1  ;;  %1176 = vst.msk [vmem:[#allocation13 + $0x98] sm:$0xff] %vm895_vm3, %v1616_v2  ;;  %v826_v3 = vpop.f32.mrb[35].mxu1  ;;  %v1088_v4 = vpop.f32.mrb[35].mxu0 }
 0x220   :  { %914 = vst.msk [vmem:[#allocation11 + $0x90] sm:$0xff] %vm895_vm3, %v826_v3  ;;  %1175 = vst.msk [vmem:[#allocation13 + $0x90] sm:$0xff] %vm895_vm3, %v1088_v4 }
 0x222   :  { %v1563_v5 = vpop.f32.mrb[36].mxu1  ;;  %v1619_v6 = vpop.f32.mrb[36].mxu0 }
 0x223   :  { %917 = vst.msk [vmem:[#allocation11 + $0xa8] sm:$0xff] %vm895_vm3, %v1563_v5  ;;  %1178 = vst.msk [vmem:[#allocation13 + $0xa8] sm:$0xff] %vm895_vm3, %v1619_v6  ;;  %v836_v7 = vpop.f32.mrb[37].mxu1  ;;  %v1098_v8 = vpop.f32.mrb[37].mxu0 }
 0x224   :  { %916 = vst.msk [vmem:[#allocation11 + $0xa0] sm:$0xff] %vm895_vm3, %v836_v7  ;;  %1177 = vst.msk [vmem:[#allocation13 + $0xa0] sm:$0xff] %vm895_vm3, %v1098_v8 }
 0x226   :  { %v1566_v9 = vpop.f32.mrb[38].mxu1  ;;  %v1622_v10 = vpop.f32.mrb[38].mxu0 }
 0x227   :  { %919 = vst.msk [vmem:[#allocation11 + $0xb8] sm:$0xff] %vm895_vm3, %v1566_v9  ;;  %1180 = vst.msk [vmem:[#allocation13 + $0xb8] sm:$0xff] %vm895_vm3, %v1622_v10  ;;  %v846_v11 = vpop.f32.mrb[39].mxu1  ;;  %v1108_v12 = vpop.f32.mrb[39].mxu0 }
 0x228   :  { %918 = vst.msk [vmem:[#allocation11 + $0xb0] sm:$0xff] %vm895_vm3, %v846_v11  ;;  %1179 = vst.msk [vmem:[#allocation13 + $0xb0] sm:$0xff] %vm895_vm3, %v1108_v12 }
 0x22a   :  { %v1569_v13 = vpop.f32.mrb[40].mxu1  ;;  %v1625_v14 = vpop.f32.mrb[40].mxu0 }
 0x22b   :  { %921 = vst.msk [vmem:[#allocation11 + $0xc8] sm:$0xff] %vm895_vm3, %v1569_v13  ;;  %1182 = vst.msk [vmem:[#allocation13 + $0xc8] sm:$0xff] %vm895_vm3, %v1625_v14  ;;  %v856_v15 = vpop.f32.mrb[41].mxu1  ;;  %v1118_v16 = vpop.f32.mrb[41].mxu0 }
 0x22c   :  { %920 = vst.msk [vmem:[#allocation11 + $0xc0] sm:$0xff] %vm895_vm3, %v856_v15  ;;  %1181 = vst.msk [vmem:[#allocation13 + $0xc0] sm:$0xff] %vm895_vm3, %v1118_v16 }
 0x22e   :  { %v1572_v17 = vpop.f32.mrb[42].mxu1  ;;  %v1628_v18 = vpop.f32.mrb[42].mxu0 }
 0x22f   :  { %923 = vst.msk [vmem:[#allocation11 + $0xd8] sm:$0xff] %vm895_vm3, %v1572_v17  ;;  %1184 = vst.msk [vmem:[#allocation13 + $0xd8] sm:$0xff] %vm895_vm3, %v1628_v18  ;;  %v866_v19 = vpop.f32.mrb[43].mxu1  ;;  %v1128_v20 = vpop.f32.mrb[43].mxu0 }
 0x230   :  { %922 = vst.msk [vmem:[#allocation11 + $0xd0] sm:$0xff] %vm895_vm3, %v866_v19  ;;  %1183 = vst.msk [vmem:[#allocation13 + $0xd0] sm:$0xff] %vm895_vm3, %v1128_v20 }
 0x232   :  { %v1575_v21 = vpop.f32.mrb[44].mxu1  ;;  %v1631_v22 = vpop.f32.mrb[44].mxu0 }
 0x233   :  { %925 = vst.msk [vmem:[#allocation11 + $0xe8] sm:$0xff] %vm895_vm3, %v1575_v21  ;;  %1186 = vst.msk [vmem:[#allocation13 + $0xe8] sm:$0xff] %vm895_vm3, %v1631_v22  ;;  %v876_v23 = vpop.f32.mrb[45].mxu1  ;;  %v1138_v24 = vpop.f32.mrb[45].mxu0 }
 0x234   :  { %924 = vst.msk [vmem:[#allocation11 + $0xe0] sm:$0xff] %vm895_vm3, %v876_v23  ;;  %1185 = vst.msk [vmem:[#allocation13 + $0xe0] sm:$0xff] %vm895_vm3, %v1138_v24 }
 0x236   :  { %v1578_v25 = vpop.f32.mrb[46].mxu1  ;;  %v1634_v26 = vpop.f32.mrb[46].mxu0 }
 0x237   :  { %927 = vst.msk [vmem:[#allocation11 + $0xf8] sm:$0xff] %vm895_vm3, %v1578_v25  ;;  %1188 = vst.msk [vmem:[#allocation13 + $0xf8] sm:$0xff] %vm895_vm3, %v1634_v26  ;;  %v886_v27 = vpop.f32.mrb[47].mxu1  ;;  %v1148_v28 = vpop.f32.mrb[47].mxu0 }
 0x238   :  { %926 = vst.msk [vmem:[#allocation11 + $0xf0] sm:$0xff] %vm895_vm3, %v886_v27  ;;  %1187 = vst.msk [vmem:[#allocation13 + $0xf0] sm:$0xff] %vm895_vm3, %v1148_v28 }
 0x239   :  { %1802 = shalt.err (!%p1799_p2)
}
 0x23a   :  { %s1803_s17 = scalar_lea.hbm %s2245_s5, 4096 }
 0x23b   :  { %p1804_p3 = scmp.ne.s32.totalorder %s2245_s5, %s1803_s17  ;;  %p1807_p4 = scmp.lt.u32.totalorder %s1803_s17, %s2245_s5 }
 0x23d   :  { %p1809_p5 = pnand %p1807_p4, %p1804_p3 }
 0x23f   :  { %1812 = shalt.err (!%p1809_p5)
}
 0x240   :  { %1212 = dma.vmem_to_hbm [thread:$0]  %s1207_s9, 4096, %s2245_s5, [#allocation12], %s1850_s0, %s1850_s0, %s1851_s24  }
 0x241   :  { %s1813_s22 = scalar_lea.vmem %s2201_s13, 4096  ;;  %p1818_p7 = scmp.lt.s32.totalorder %s2201_s13, %s2201_s13 }
 0x242   :  { %p1814_p6 = scmp.ne.s32.totalorder %s2201_s13, %s1813_s22  ;;  %p1819_p8 = scmp.lt.s32.totalorder %s1813_s22, %s1813_s22 }
 0x244   :  { %p1820_p9 = por %p1819_p8, %p1818_p7 }
 0x246   :  { %p1821_p10 = pnand %p1820_p9, %p1814_p6 }
 0x248   :  { %1824 = shalt.err (!%p1821_p10)
}
 0x249   :  { %s1825_s25 = scalar_lea.hbm %s2246_s6, 4096 }
 0x24a   :  { %p1826_p11 = scmp.ne.s32.totalorder %s2246_s6, %s1825_s25  ;;  %p1829_p12 = scmp.lt.u32.totalorder %s1825_s25, %s2246_s6 }
 0x24c   :  { %p1831_p13 = pnand %p1829_p12, %p1826_p11 }
 0x24e   :  { %1834 = shalt.err (!%p1831_p13)
}
 0x24f   :  { %1224 = dma.vmem_to_hbm [thread:$0]  %s2201_s13, 4096, %s2246_s6, [#allocation12], %s1850_s0, %s1850_s0, %s1851_s24  }
 0x250   :  { %1841 = dma.done.wait [#allocation4], 2048  }
 0x251   :  { %1842 = vsyncadd [#allocation4], 4294965248 }
 0x252   :  { %1843 = dma.done.wait [#allocation12], 8192  }
 0x253   :  { %1844 = vsyncadd [#allocation12], 4294959104 }
 0x254   :  { %1234 = vsyncpa [#allocation3], 1 }
 0x255   :  { %1235 = vsyncpa [#allocation6], 1 }
 0x256   :  { %1236 = vsyncpa [#allocation9], 1 }
 0x257   :  { %1237 = vsyncpa [#allocation4], 1 }
 0x258   :  { %1238 = vsyncpa [#allocation12], 1 }

</bundles_post_ra>
